<compile_context>
chip_gen: v5e
topology: v5e:2x2
jax: 0.10.0
libtpu: 0.0.40
codegen_flags: <defaults>
</compile_context>

<pallas_src>
import functools
import math

import jax
import jax.numpy as jnp
from jax.experimental import pallas as pl
from jax.experimental.pallas import tpu as pltpu

_INV_SQRT2 = 0.7071067811865476


def _round_up(a, m):
    return -(-a // m) * m


def _gelu_exact(x):
    # torch.nn.functional.gelu default (erf-based, not tanh approximation)
    return 0.5 * x * (1.0 + jax.lax.erf(x * _INV_SQRT2))


def _dishts_norm_kernel(x_ref, wl_ref, wh_ref, gamma_ref, beta_ref,
                        o_ref, stats_ref, *, activate):
    # x_ref block: (1, L, C) -- C lane-columns, each with its own weight column.
    x = x_ref[0].astype(jnp.float32)          # (L, C)  f32 accumulation
    wl = wl_ref[...].astype(jnp.float32)      # (L, C)
    wh = wh_ref[...].astype(jnp.float32)      # (L, C)
    L = x.shape[0]

    # theta = per-column weighted sum over the lookback (sublane) axis
    phil = jnp.sum(x * wl, axis=0, keepdims=True)                 # (1, C)
    phih = jnp.sum(x * wh, axis=0, keepdims=True)                 # (1, C)
    if activate:
        phil = _gelu_exact(phil)
        phih = _gelu_exact(phih)

    xm_l = x - phil
    xm_h = x - phih
    inv_lm1 = 1.0 / (L - 1.0)
    xil = jnp.sum(xm_l * xm_l, axis=0, keepdims=True) * inv_lm1   # (1, C)
    xih = jnp.sum(xm_h * xm_h, axis=0, keepdims=True) * inv_lm1   # (1, C)

    # folded scale: one rsqrt on a (1, C) row (EUP slot) instead of a
    # full-block divide plus a separate gamma multiply on the VPU.
    scale = gamma_ref[...].astype(jnp.float32) * jax.lax.rsqrt(xil + 1e-8)
    o_ref[0] = (xm_l * scale + beta_ref[...].astype(jnp.float32)).astype(o_ref.dtype)

    # side-state for mode='denorm', packed as rows [phil, phih, xil, xih]
    stats_ref[0, 0:1, :] = phil
    stats_ref[0, 1:2, :] = phih
    stats_ref[0, 2:3, :] = xil
    stats_ref[0, 3:4, :] = xih


def _plan_layout(B, L, N, itemsize, block_bytes, fuse_cap):
    """Pick a lane-dense blocking.

    Returns (fuse_batches, n_pad, b_pad, tb, tc):
      fuse_batches=True : x presented as a (1, L, b_pad*N) slab; each (1, L, tc)
        block holds tb = tc // N whole batch elements on the lane axis
        (tc % 128 == 0, or tc is the full lane extent).
      fuse_batches=False: features zero-padded to n_pad (multiple of 128) and
        the feature axis tiled by tc (tc | n_pad, tc % 128 == 0); one batch
        element per block.
    """
    col_bytes = L * itemsize                     # bytes of one lane-column
    lane_unit = 128 // math.gcd(N, 128)          # batches per 128-aligned group

    if lane_unit * N * col_bytes <= fuse_cap:    # small-N: fuse batches into lanes
        tb = max(lane_unit,
                 (block_bytes // (N * col_bytes)) // lane_unit * lane_unit)
        if tb >= B:
            if B < 2 * lane_unit:                # no legal split -> one full block
                return True, N, B, B, B * N
            # keep >= 2 grid points so both v7x TensorCores get work
            tb = _round_up((B + 1) // 2, lane_unit)
        return True, N, _round_up(B, tb), tb, tb * N

    # large-N: pad features to a multiple of 128 and tile the feature axis
    # (padding overhead <= 127/N, small when N is large)
    n_pad = _round_up(N, 128)
    tc = n_pad
    while tc > 128 and tc * col_bytes > block_bytes:
        nxt = tc // 2
        tc = nxt if (nxt % 128 == 0 and n_pad % nxt == 0) else 128
    return False, n_pad, B, 1, tc


def dishts_norm(x, reduce_mlayer, gamma, beta, *, activate=True,
                block_bytes=2 * 1024 * 1024, fuse_cap=4 * 1024 * 1024):
    """DishTS forward, mode='norm'.

    x: (B, L, N); reduce_mlayer: (N, L, 2); gamma, beta: (N,).
    Returns (out, stats): out (B, L, N) in x.dtype, stats = dict of
    phil/xil/phih/xih, each (B, 1, N) float32 (side-state for 'denorm').
    """
    B, L, N = x.shape
    if L < 2:
        raise ValueError("DishTS requires seq_len > 1 (divides by seq_len - 1).")
    itemsize = jnp.dtype(x.dtype).itemsize

    fuse, n_pad, b_pad, tb, tc = _plan_layout(B, L, N, itemsize,
                                              block_bytes, fuse_cap)

    wl = jnp.transpose(reduce_mlayer[:, :, 0])       # (L, N)
    wh = jnp.transpose(reduce_mlayer[:, :, 1])       # (L, N)
    g2 = gamma.reshape(1, N)
    b2 = beta.reshape(1, N)

    if fuse:
        # lane-dense batch fusion: lane index = batch * N + feature
        xp = x if b_pad == B else jnp.pad(x, ((0, b_pad - B), (0, 0), (0, 0)))
        xk = jnp.transpose(xp, (1, 0, 2)).reshape(L, b_pad * N)[None]  # (1,L,b_pad*N)
        wlk = jnp.tile(wl, (1, tb))                  # (L, tc)  VMEM-resident
        whk = jnp.tile(wh, (1, tb))
        gk = jnp.tile(g2, (1, tb))                   # (1, tc)
        bk = jnp.tile(b2, (1, tb))
        grid = (1, (b_pad * N) // tc)
    else:
        # feature-tiled: pad N to a multiple of 128, one batch element per block
        pad_n = n_pad - N
        xk = jnp.pad(x, ((0, 0), (0, 0), (0, pad_n)))      # (B, L, n_pad)
        wlk = jnp.pad(wl, ((0, 0), (0, pad_n)))            # (L, n_pad)
        whk = jnp.pad(wh, ((0, 0), (0, pad_n)))
        gk = jnp.pad(g2, ((0, 0), (0, pad_n)))
        bk = jnp.pad(b2, ((0, 0), (0, pad_n)))
        grid = (B, n_pad // tc)

    wn = wlk.shape[1]
    w_idx = (lambda b, f: (0, 0)) if wn == tc else (lambda b, f: (0, f))

    rows, cols = xk.shape[0], xk.shape[2]
    data_spec = pl.BlockSpec((1, L, tc), lambda b, f: (b, 0, f))
    stat_spec = pl.BlockSpec((1, 4, tc), lambda b, f: (b, 0, f))

    out_f, stats_f = pl.pallas_call(
        functools.partial(_dishts_norm_kernel, activate=activate),
        out_shape=(
            jax.ShapeDtypeStruct((rows, L, cols), x.dtype),
            jax.ShapeDtypeStruct((rows, 4, cols), jnp.float32),
        ),
        grid=grid,
        in_specs=[
            data_spec,                         # x slab (tiled over lanes/features)
            pl.BlockSpec((L, tc), w_idx),      # W[:, :, 0] (resident / f-sliced)
            pl.BlockSpec((L, tc), w_idx),      # W[:, :, 1]
            pl.BlockSpec((1, tc), w_idx),      # gamma
            pl.BlockSpec((1, tc), w_idx),      # beta
        ],
        out_specs=(data_spec, stat_spec),
        compiler_params=pltpu.CompilerParams(
            dimension_semantics=("parallel", "parallel"),
            vmem_limit_bytes=48 * 1024 * 1024,
        ),
        cost_estimate=pl.CostEstimate(
            flops=10 * rows * L * cols,
            transcendentals=3 * rows * cols,
            bytes_accessed=(2 * rows * L * cols * itemsize      # x in + out
                            + 4 * rows * cols * 4               # packed stats
                            + 2 * L * wn * itemsize),
        ),
    )(xk, wlk, whk, gk, bk)

    if fuse:
        out = jnp.transpose(out_f[0].reshape(L, b_pad, N), (1, 0, 2))[:B]
        st = stats_f[0].reshape(4, b_pad, N)[:, :B]              # (4, B, N)
        stats = {"phil": st[0][:, None, :], "phih": st[1][:, None, :],
                 "xil": st[2][:, None, :], "xih": st[3][:, None, :]}
    else:
        out = out_f[:, :, :N]
        stats = {"phil": stats_f[:, 0:1, :N], "phih": stats_f[:, 1:2, :N],
                 "xil": stats_f[:, 2:3, :N], "xih": stats_f[:, 3:4, :N]}
    return out, stats


def _reference(x, reduce_mlayer, gamma, beta, activate=True):
    """Pure-JAX mirror of the PyTorch forward (mode='norm') in float32."""
    xf = x.astype(jnp.float32)
    w = reduce_mlayer.astype(jnp.float32)
    L = x.shape[1]
    theta = jnp.einsum("bln,nlk->bkn", xf, w)
    if activate:
        theta = 0.5 * theta * (1.0 + jax.lax.erf(theta / jnp.sqrt(2.0)))
    phil, phih = theta[:, :1, :], theta[:, 1:, :]
    xil = jnp.sum((xf - phil) ** 2, axis=1, keepdims=True) / (L - 1)
    xih = jnp.sum((xf - phih) ** 2, axis=1, keepdims=True) / (L - 1)
    out = (xf - phil) / jnp.sqrt(xil + 1e-8) * gamma.astype(jnp.float32) \
        + beta.astype(jnp.float32)
    return out, phil, xil, phih, xih


if __name__ == "__main__":
    def check(name, B, L, N, dtype=jnp.float32, rtol=1e-5, atol=1e-5, **plan_kw):
        key = jax.random.PRNGKey(0)
        kx, kw = jax.random.split(key)
        x = jax.random.normal(kx, (B, L, N), dtype=jnp.float32).astype(dtype)
        # dish_init='standard': torch.rand(N, L, 2) / L
        reduce_mlayer = jax.random.uniform(kw, (N, L, 2), dtype=jnp.float32) / L
        gamma = jnp.ones((N,), jnp.float32)
        beta = jnp.zeros((N,), jnp.float32)

        out, stats = dishts_norm(x, reduce_mlayer, gamma, beta, **plan_kw)
        out = jax.block_until_ready(out)

        ref_out, ref_phil, ref_xil, ref_phih, ref_xih = _reference(
            x, reduce_mlayer, gamma, beta)
        assert out.shape == (B, L, N) and out.dtype == x.dtype, name
        assert jnp.allclose(out.astype(jnp.float32), ref_out,
                            rtol=rtol, atol=atol), f"{name}: out mismatch"
        for key_s, want in (("phil", ref_phil), ("xil", ref_xil),
                            ("phih", ref_phih), ("xih", ref_xih)):
            got = stats[key_s]
            assert got.shape == (B, 1, N), f"{name}: {key_s} shape"
            assert jnp.allclose(got, want, rtol=rtol, atol=atol), \
                f"{name}: {key_s} mismatch"

    # 1) default plan: batch-fused lane-dense layout, single full-extent block
    check("fused_single_block", B=2, L=8, N=4)
    # 2) batch-fused multi-block path (tiny budget forces tb=2 + batch padding)
    check("fused_multi_block", B=3, L=8, N=128, block_bytes=8192)
    # 3) feature-tiled path (fusion disabled; N padded 300->384, tiled by 128)
    check("feature_tiled", B=2, L=16, N=300, block_bytes=8192, fuse_cap=0)
    # 4) bf16 input: reductions still accumulate in float32 inside the kernel
    check("bf16_input", B=2, L=8, N=4, dtype=jnp.bfloat16, rtol=2e-2, atol=2e-2)

    print("KERNEL_OK")
</pallas_src>

<mosaic_0001>
module attributes {stable_mosaic.version = 11 : i64} {
  func.func @_dishts_norm_kernel(%arg0: i32, %arg1: i32, %arg2: memref<1x8x8xf32, #tpu.memory_space<vmem>>, %arg3: memref<8x8xf32, #tpu.memory_space<vmem>>, %arg4: memref<8x8xf32, #tpu.memory_space<vmem>>, %arg5: memref<1x8xf32, #tpu.memory_space<vmem>>, %arg6: memref<1x8xf32, #tpu.memory_space<vmem>>, %arg7: memref<1x8x8xf32, #tpu.memory_space<vmem>>, %arg8: memref<1x4x8xf32, #tpu.memory_space<vmem>>) attributes {dimension_semantics = [#tpu.dimension_semantics<parallel>, #tpu.dimension_semantics<parallel>], iteration_bounds = array<i64: 1, 1>, scalar_prefetch = 0 : i64, scratch_operands = 0 : i64, tpu.core_type = #tpu.core_type<tc>, window_params = [{transform_indices = @transform_0, window_bounds = array<i64: 1, 8, 8>}, {pipeline_mode = #tpu.pipeline_mode<synchronous>, transform_indices = @transform_1, window_bounds = array<i64: 8, 8>}, {pipeline_mode = #tpu.pipeline_mode<synchronous>, transform_indices = @transform_2, window_bounds = array<i64: 8, 8>}, {pipeline_mode = #tpu.pipeline_mode<synchronous>, transform_indices = @transform_3, window_bounds = array<i64: 1, 8>}, {pipeline_mode = #tpu.pipeline_mode<synchronous>, transform_indices = @transform_4, window_bounds = array<i64: 1, 8>}, {transform_indices = @transform_5, window_bounds = array<i64: 1, 8, 8>}, {transform_indices = @transform_6, window_bounds = array<i64: 1, 4, 8>}]} {
    %c0 = arith.constant 0 : index
    %c0_0 = arith.constant 0 : index
    %c0_1 = arith.constant 0 : index
    %0 = vector.load %arg2[%c0, %c0_0, %c0_1] : memref<1x8x8xf32, #tpu.memory_space<vmem>>, vector<1x8x8xf32>
    %1 = vector.shape_cast %0 : vector<1x8x8xf32> to vector<8x8xf32>
    %c0_2 = arith.constant 0 : index
    %c0_3 = arith.constant 0 : index
    %2 = vector.load %arg3[%c0_2, %c0_3] : memref<8x8xf32, #tpu.memory_space<vmem>>, vector<8x8xf32>
    %c0_4 = arith.constant 0 : index
    %c0_5 = arith.constant 0 : index
    %3 = vector.load %arg4[%c0_4, %c0_5] : memref<8x8xf32, #tpu.memory_space<vmem>>, vector<8x8xf32>
    %4 = arith.mulf %1, %2 : vector<8x8xf32>
    %cst = arith.constant dense<0.000000e+00> : vector<8xf32>
    %5 = vector.multi_reduction <add>, %4, %cst [0] : vector<8x8xf32> to vector<8xf32>
    %6 = vector.shape_cast %5 : vector<8xf32> to vector<1x8xf32>
    %7 = arith.mulf %1, %3 : vector<8x8xf32>
    %cst_6 = arith.constant dense<0.000000e+00> : vector<8xf32>
    %8 = vector.multi_reduction <add>, %7, %cst_6 [0] : vector<8x8xf32> to vector<8xf32>
    %9 = vector.shape_cast %8 : vector<8xf32> to vector<1x8xf32>
    %cst_7 = arith.constant 5.000000e-01 : f32
    %10 = vector.broadcast %cst_7 : f32 to vector<1x8xf32>
    %11 = arith.mulf %10, %6 : vector<1x8xf32>
    %cst_8 = arith.constant 0.707106769 : f32
    %12 = vector.broadcast %cst_8 : f32 to vector<1x8xf32>
    %13 = arith.mulf %6, %12 : vector<1x8xf32>
    %14 = math.erf %13 : vector<1x8xf32>
    %cst_9 = arith.constant 1.000000e+00 : f32
    %15 = vector.broadcast %cst_9 : f32 to vector<1x8xf32>
    %16 = arith.addf %15, %14 : vector<1x8xf32>
    %17 = arith.mulf %11, %16 : vector<1x8xf32>
    %cst_10 = arith.constant 5.000000e-01 : f32
    %18 = vector.broadcast %cst_10 : f32 to vector<1x8xf32>
    %19 = arith.mulf %18, %9 : vector<1x8xf32>
    %cst_11 = arith.constant 0.707106769 : f32
    %20 = vector.broadcast %cst_11 : f32 to vector<1x8xf32>
    %21 = arith.mulf %9, %20 : vector<1x8xf32>
    %22 = math.erf %21 : vector<1x8xf32>
    %cst_12 = arith.constant 1.000000e+00 : f32
    %23 = vector.broadcast %cst_12 : f32 to vector<1x8xf32>
    %24 = arith.addf %23, %22 : vector<1x8xf32>
    %25 = arith.mulf %19, %24 : vector<1x8xf32>
    %26 = vector.broadcast %17 : vector<1x8xf32> to vector<8x8xf32>
    %27 = arith.subf %1, %26 : vector<8x8xf32>
    %28 = vector.broadcast %25 : vector<1x8xf32> to vector<8x8xf32>
    %29 = arith.subf %1, %28 : vector<8x8xf32>
    %30 = arith.mulf %27, %27 : vector<8x8xf32>
    %cst_13 = arith.constant dense<0.000000e+00> : vector<8xf32>
    %31 = vector.multi_reduction <add>, %30, %cst_13 [0] : vector<8x8xf32> to vector<8xf32>
    %32 = vector.shape_cast %31 : vector<8xf32> to vector<1x8xf32>
    %cst_14 = arith.constant 0.142857149 : f32
    %33 = vector.broadcast %cst_14 : f32 to vector<1x8xf32>
    %34 = arith.mulf %32, %33 : vector<1x8xf32>
    %35 = arith.mulf %29, %29 : vector<8x8xf32>
    %cst_15 = arith.constant dense<0.000000e+00> : vector<8xf32>
    %36 = vector.multi_reduction <add>, %35, %cst_15 [0] : vector<8x8xf32> to vector<8xf32>
    %37 = vector.shape_cast %36 : vector<8xf32> to vector<1x8xf32>
    %cst_16 = arith.constant 0.142857149 : f32
    %38 = vector.broadcast %cst_16 : f32 to vector<1x8xf32>
    %39 = arith.mulf %37, %38 : vector<1x8xf32>
    %c0_17 = arith.constant 0 : index
    %c0_18 = arith.constant 0 : index
    %40 = vector.load %arg5[%c0_17, %c0_18] : memref<1x8xf32, #tpu.memory_space<vmem>>, vector<1x8xf32>
    %cst_19 = arith.constant 9.99999993E-9 : f32
    %41 = vector.broadcast %cst_19 : f32 to vector<1x8xf32>
    %42 = arith.addf %34, %41 : vector<1x8xf32>
    %43 = math.rsqrt %42 : vector<1x8xf32>
    %44 = arith.mulf %40, %43 : vector<1x8xf32>
    %45 = vector.broadcast %44 : vector<1x8xf32> to vector<8x8xf32>
    %46 = arith.mulf %27, %45 : vector<8x8xf32>
    %c0_20 = arith.constant 0 : index
    %c0_21 = arith.constant 0 : index
    %47 = vector.load %arg6[%c0_20, %c0_21] : memref<1x8xf32, #tpu.memory_space<vmem>>, vector<1x8xf32>
    %48 = vector.broadcast %47 : vector<1x8xf32> to vector<8x8xf32>
    %49 = arith.addf %46, %48 : vector<8x8xf32>
    %c0_22 = arith.constant 0 : index
    %c0_23 = arith.constant 0 : index
    %c0_24 = arith.constant 0 : index
    %50 = vector.load %arg7[%c0_22, %c0_23, %c0_24] : memref<1x8x8xf32, #tpu.memory_space<vmem>>, vector<1x8x8xf32>
    %51 = vector.shape_cast %50 : vector<1x8x8xf32> to vector<8x8xf32>
    %52 = vector.shape_cast %49 : vector<8x8xf32> to vector<1x8x8xf32>
    tpu.vector_store %arg7[%c0_22, %c0_23, %c0_24], %52 {strides = array<i32>} : memref<1x8x8xf32, #tpu.memory_space<vmem>>, vector<1x8x8xf32>,
    %c0_25 = arith.constant 0 : index
    %c0_26 = arith.constant 0 : index
    %c0_27 = arith.constant 0 : index
    %53 = vector.load %arg8[%c0_25, %c0_26, %c0_27] : memref<1x4x8xf32, #tpu.memory_space<vmem>>, vector<1x1x8xf32>
    %54 = vector.shape_cast %53 : vector<1x1x8xf32> to vector<1x8xf32>
    %55 = vector.shape_cast %17 : vector<1x8xf32> to vector<1x1x8xf32>
    tpu.vector_store %arg8[%c0_25, %c0_26, %c0_27], %55 {strides = array<i32>} : memref<1x4x8xf32, #tpu.memory_space<vmem>>, vector<1x1x8xf32>,
    %c0_28 = arith.constant 0 : index
    %c1 = arith.constant 1 : index
    %c0_29 = arith.constant 0 : index
    %56 = vector.load %arg8[%c0_28, %c1, %c0_29] : memref<1x4x8xf32, #tpu.memory_space<vmem>>, vector<1x1x8xf32>
    %57 = vector.shape_cast %56 : vector<1x1x8xf32> to vector<1x8xf32>
    %58 = vector.shape_cast %25 : vector<1x8xf32> to vector<1x1x8xf32>
    tpu.vector_store %arg8[%c0_28, %c1, %c0_29], %58 {strides = array<i32>} : memref<1x4x8xf32, #tpu.memory_space<vmem>>, vector<1x1x8xf32>,
    %c0_30 = arith.constant 0 : index
    %c2 = arith.constant 2 : index
    %c0_31 = arith.constant 0 : index
    %59 = vector.load %arg8[%c0_30, %c2, %c0_31] : memref<1x4x8xf32, #tpu.memory_space<vmem>>, vector<1x1x8xf32>
    %60 = vector.shape_cast %59 : vector<1x1x8xf32> to vector<1x8xf32>
    %61 = vector.shape_cast %34 : vector<1x8xf32> to vector<1x1x8xf32>
    tpu.vector_store %arg8[%c0_30, %c2, %c0_31], %61 {strides = array<i32>} : memref<1x4x8xf32, #tpu.memory_space<vmem>>, vector<1x1x8xf32>,
    %c0_32 = arith.constant 0 : index
    %c3 = arith.constant 3 : index
    %c0_33 = arith.constant 0 : index
    %62 = vector.load %arg8[%c0_32, %c3, %c0_33] : memref<1x4x8xf32, #tpu.memory_space<vmem>>, vector<1x1x8xf32>
    %63 = vector.shape_cast %62 : vector<1x1x8xf32> to vector<1x8xf32>
    %64 = vector.shape_cast %39 : vector<1x8xf32> to vector<1x1x8xf32>
    tpu.vector_store %arg8[%c0_32, %c3, %c0_33], %64 {strides = array<i32>} : memref<1x4x8xf32, #tpu.memory_space<vmem>>, vector<1x1x8xf32>,
    return
  }
  func.func @transform_0(%arg0: i32, %arg1: i32) -> (i32, i32, i32) {
    %c0_i32 = arith.constant 0 : i32
    %c0_i32_0 = arith.constant 0 : i32
    return %arg0, %c0_i32, %arg1 : i32, i32, i32
  }
  func.func @transform_1(%arg0: i32, %arg1: i32) -> (i32, i32) {
    %c0_i32 = arith.constant 0 : i32
    %c0_i32_0 = arith.constant 0 : i32
    %c0_i32_1 = arith.constant 0 : i32
    return %c0_i32, %c0_i32_0 : i32, i32
  }
  func.func @transform_2(%arg0: i32, %arg1: i32) -> (i32, i32) {
    %c0_i32 = arith.constant 0 : i32
    %c0_i32_0 = arith.constant 0 : i32
    %c0_i32_1 = arith.constant 0 : i32
    return %c0_i32, %c0_i32_0 : i32, i32
  }
  func.func @transform_3(%arg0: i32, %arg1: i32) -> (i32, i32) {
    %c0_i32 = arith.constant 0 : i32
    %c0_i32_0 = arith.constant 0 : i32
    %c0_i32_1 = arith.constant 0 : i32
    return %c0_i32, %c0_i32_0 : i32, i32
  }
  func.func @transform_4(%arg0: i32, %arg1: i32) -> (i32, i32) {
    %c0_i32 = arith.constant 0 : i32
    %c0_i32_0 = arith.constant 0 : i32
    %c0_i32_1 = arith.constant 0 : i32
    return %c0_i32, %c0_i32_0 : i32, i32
  }
  func.func @transform_5(%arg0: i32, %arg1: i32) -> (i32, i32, i32) {
    %c0_i32 = arith.constant 0 : i32
    %c0_i32_0 = arith.constant 0 : i32
    return %arg0, %c0_i32, %arg1 : i32, i32, i32
  }
  func.func @transform_6(%arg0: i32, %arg1: i32) -> (i32, i32, i32) {
    %c0_i32 = arith.constant 0 : i32
    %c0_i32_0 = arith.constant 0 : i32
    return %arg0, %c0_i32, %arg1 : i32, i32, i32
  }
}

</mosaic_0001>

<bundles_post_ra>
// kernel: tpu_custom_call.1
= control target key start
LH: loop header
LB: loop body
LE: loop exit
PB: predicated region body
PF: predicated region fallthrough
CT: control target
= control target key end

     0   :  { %12 = vsyncpa [#allocation3], 0  ;;  %s487_s0 = inlined_call_operand.hbm [shape: f32[1,8,8], index: 0, kind: input, shape index: {}]   ;;  %s488_s1 = inlined_call_operand.hbm [shape: f32[8,8], index: 1, kind: input, shape index: {}]   ;;  %s489_s2 = inlined_call_operand.hbm [shape: f32[8,8], index: 2, kind: input, shape index: {}]   ;;  %s490_s3 = inlined_call_operand.vmem [shape: f32[1,8], index: 3, kind: input, shape index: {}]   ;;  %s491_s4 = inlined_call_operand.vmem [shape: f32[1,8], index: 4, kind: input, shape index: {}]   ;;  %s492_s5 = inlined_call_operand.hbm [shape: f32[1,8,8], index: 5, kind: output, shape index: {0}]   ;;  %s493_s6 = inlined_call_operand.hbm [shape: f32[1,4,8], index: 6, kind: output, shape index: {1}]  }
   0x1   :  { %13 = vsyncpa [#allocation6], 0 }
   0x2   :  { %14 = vsyncpa [#allocation4], 0  ;;  %s32_s23 = sshll.u32 %s488_s1, 4  ;;  %s33_s23 = int_to_ptr.hbm [resolvable:$true] %s32_s23 }
   0x3   :  { %15 = vsyncpa [#allocation10], 0  ;;  %s397_s24 = smov [#allocation5]   ;;  %s21_s28 = sshll.u32 %s487_s0, 4  ;;  %s22_s28 = int_to_ptr.hbm [resolvable:$true] %s21_s28 }
   0x4   :  { %s34_s25 = sshll.u32 %s397_s24, 4  ;;  %s398_s29 = smov [#allocation2]   ;;  %s35_s25 = int_to_ptr.vmem [resolvable:$true] %s34_s25 }
   0x5   :  { %37 = dma.hbm_to_vmem [thread:$0]  %s33_s23, 128, %s35_s25, [#allocation6]  }
   0x6   :  { %s23_s30 = sshll.u32 %s398_s29, 4  ;;  %s43_s9 = sshll.u32 %s489_s2, 4  ;;  %s24_s30 = int_to_ptr.vmem [resolvable:$true] %s23_s30  ;;  %s44_s9 = int_to_ptr.hbm [resolvable:$true] %s43_s9 }
   0x7   :  { %26 = dma.hbm_to_vmem [thread:$0]  %s22_s28, 128, %s24_s30, [#allocation3]  }
   0x8   :  { %s399_s1 = smov [#allocation7]  }
   0x9   :  { %s45_s10 = sshll.u32 %s399_s1, 4  ;;  %s46_s10 = int_to_ptr.vmem [resolvable:$true] %s45_s10 }
   0xa   :  { %48 = dma.hbm_to_vmem [thread:$0]  %s44_s9, 128, %s46_s10, [#allocation6]  }
   0xb   :  { %389 = dma.done.wait [#allocation3], 128  }
   0xc   :  { %390 = vsyncadd [#allocation3], 4294967168 }
   0xd   :  { %391 = dma.done.wait [#allocation6], 256  }
   0xe   :  { %392 = vsyncadd [#allocation6], 4294967040  ;;  %v446_v0 = vld [vmem:[#allocation2] sm:$0xff]  ;;  %v66_v1 = vld [vmem:[#allocation5] sm:$0xff]  ;;  %vm69_vm0 = vcmask 64512   ;;  %vm216_vm9 = vcmask 57344  }
   0xf   :  { %v67_v2 = vld [vmem:[#allocation7] sm:$0xff]  ;;  %v68_v3 = vmul.f32 %v66_v1, %v446_v0  ;;  %s400_s0 = smov [#allocation9]   ;;  %s239_s13 = sshll.u32 %s493_s6, 4  ;;  %s240_s13 = int_to_ptr.hbm [resolvable:$true] %s239_s13 }
  0x10   :  { %v77_v4 = vmul.f32 %v67_v2, %v446_v0  ;;  %s237_s2 = sshll.u32 %s400_s0, 4  ;;  %s401_s17 = smov [#allocation8]   ;;  %s238_s2 = int_to_ptr.vmem [resolvable:$true] %s237_s2 }
  0x11   :  { %v70_v5 = vsel %vm69_vm0, %v68_v3, 0.0  ;;  %s226_s18 = sshll.u32 %s401_s17, 4  ;;  %s228_s21 = sshll.u32 %s492_s5, 4  ;;  %s227_s18 = int_to_ptr.vmem [resolvable:$true] %s226_s18  ;;  %s229_s21 = int_to_ptr.hbm [resolvable:$true] %s228_s21 }
  0x12   :  { %v78_v6 = vsel %vm69_vm0, %v77_v4, 0.0  ;;  %v71_v7 = vrot.slane %v70_v5, 4 }
  0x13   :  { %v79_v8 = vrot.slane %v78_v6, 4 }
  0x14   :  { %v72_v9 = vadd.f32 %v71_v7, %v70_v5 }
  0x15   :  { %v80_v10 = vadd.f32 %v79_v8, %v78_v6 }
  0x16   :  { %v73_v11 = vrot.slane %v72_v9, 2 }
  0x17   :  { %v81_v12 = vrot.slane %v80_v10, 2 }
  0x18   :  { %v74_v13 = vadd.f32 %v73_v11, %v72_v9 }
  0x19   :  { %v82_v14 = vadd.f32 %v81_v12, %v80_v10 }
  0x1a   :  { %v75_v15 = vrot.slane %v74_v13, 1 }
  0x1b   :  { %v83_v16 = vrot.slane %v82_v14, 1 }
  0x1c   :  { %v452_v17 = vadd.f32 %v75_v15, %v74_v13 }
  0x1d   :  { %v454_v18 = vadd.f32 %v83_v16, %v82_v14 }
  0x1e   :  { %v457_v19 = vmul.f32 0.70710677, %v452_v17 }
  0x1f   :  { %v460_v20 = vmul.f32 0.70710677, %v454_v18 }
  0x20   :  { %v87_v21 = vmul.f32 %v457_v19, %v457_v19 }
  0x21   :  { %v131_v22 = vmul.f32 %v460_v20, %v460_v20 }
  0x22   :  { %v88_v23 = vmin.f32 %v87_v21, 16.0 }
  0x23   :  { %v132_v24 = vmin.f32 %v131_v22, 16.0 }
  0x24   :  { %v89_v25 = vmul.f32 2.1237322e-06, %v88_v23  ;;  %v100_v26 = vmul.f32 3.8918573e-05, %v88_v23 }
  0x25   :  { %v144_v27 = vmul.f32 3.8918573e-05, %v132_v24  ;;  %v133_v43 = vmul.f32 2.1237322e-06, %v132_v24 }
  0x26   :  { %v90_v28 = vadd.f32 0.00028619796, %v89_v25  ;;  %v101_v29 = vadd.f32 0.001143296, %v100_v26 }
  0x27   :  { %v145_v30 = vadd.f32 0.001143296, %v144_v27  ;;  %v134_v46 = vadd.f32 0.00028619796, %v133_v43 }
  0x28   :  { %v91_v31 = vmul.f32 %v90_v28, %v88_v23  ;;  %v102_v32 = vmul.f32 %v101_v29, %v88_v23 }
  0x29   :  { %v146_v33 = vmul.f32 %v145_v30, %v132_v24  ;;  %v135_v50 = vmul.f32 %v134_v46, %v132_v24  ;;  %v85_v30 = vmul.f32 0.5, %v452_v17 }
  0x2a   :  { %v92_v34 = vadd.f32 0.0036580483, %v91_v31  ;;  %v103_v35 = vadd.f32 0.014752088, %v102_v32  ;;  %v129_v32 = vmul.f32 0.5, %v454_v18 }
  0x2b   :  { %v147_v36 = vadd.f32 0.014752088, %v146_v33  ;;  %v136_v53 = vadd.f32 0.0036580483, %v135_v50 }
  0x2c   :  { %v93_v37 = vmul.f32 %v92_v34, %v88_v23  ;;  %v104_v38 = vmul.f32 %v103_v35, %v88_v23 }
  0x2d   :  { %v148_v39 = vmul.f32 %v147_v36, %v132_v24  ;;  %v137_v57 = vmul.f32 %v136_v53, %v132_v24 }
  0x2e   :  { %v105_v40 = vadd.f32 0.112945676, %v104_v38  ;;  %v94_v42 = vadd.f32 0.05243302, %v93_v37 }
  0x2f   :  { %v149_v41 = vadd.f32 0.112945676, %v148_v39  ;;  %v138_v58 = vadd.f32 0.05243302, %v137_v57 }
  0x30   :  { %v106_v44 = vmul.f32 %v105_v40, %v88_v23  ;;  %v95_v49 = vmul.f32 %v94_v42, %v88_v23 }
  0x31   :  { %v150_v45 = vmul.f32 %v149_v41, %v132_v24  ;;  %v139_v60 = vmul.f32 %v138_v58, %v132_v24 }
  0x32   :  { %v107_v47 = vadd.f32 0.4994258, %v106_v44  ;;  %v96_v56 = vadd.f32 0.18741608, %v95_v49 }
  0x33   :  { %v151_v48 = vadd.f32 0.4994258, %v150_v45  ;;  %v140_v61 = vadd.f32 0.18741608, %v139_v60 }
  0x34   :  { %v108_v51 = vmul.f32 %v107_v47, %v88_v23  ;;  %v97_v59 = vmul.f32 %v96_v56, %v88_v23 }
  0x35   :  { %v152_v52 = vmul.f32 %v151_v48, %v132_v24  ;;  %v141_v3 = vmul.f32 %v140_v61, %v132_v24 }
  0x36   :  { %v109_v54 = vadd.f32 1.0, %v108_v51  ;;  %v98_v1 = vadd.f32 1.1283791, %v97_v59  ;;  %v193_v59 = vld [vmem:[%s490_s3] sm:$0x1] }
  0x37   :  { %v153_v55 = vadd.f32 1.0, %v152_v52  ;;  %v142_v8 = vadd.f32 1.1283791, %v141_v3 }
  0x38   :  { %263 = vrcp.f32 %v109_v54  ;;  %vm115_vm1 = vweird.f32 %v109_v54  ;;  %v119_v4 = vand.u32 2147483647, %v109_v54  ;;  %v121_v5 = vand.u32 2147483648, %v109_v54 }
  0x39   :  { %265 = vrcp.f32 %v153_v55  ;;  %v165_v9 = vand.u32 2147483648, %v153_v55  ;;  %vm159_vm3 = vweird.f32 %v153_v55  ;;  %v163_v11 = vand.u32 2147483647, %v153_v55 }
  0x3a   :  { %v122_v13 = vor.u32 1.1754944e-38, %v121_v5  ;;  %v99_v15 = vmul.f32 %v98_v1, %v457_v19  ;;  %vm120_vm6 = vcmp.eq.f32.partialorder %v119_v4, 8.507059e+37  ;;  %v143_v22 = vmul.f32 %v142_v8, %v460_v20  ;;  %v262_v1 = vld [vmem:[%s491_s4] ss:$0 sm:$0xff] }
  0x3b   :  { %v166_v21 = vor.u32 1.1754944e-38, %v165_v9  ;;  %vm164_vm8 = vcmp.eq.f32.partialorder %v163_v11, 8.507059e+37 }
  0x3e   :  { %v264_v62 = vpop.eup %263 }
  0x3f   :  { %v266_v63 = vpop.eup %265  ;;  %v111_v2 = vmul.f32 %v264_v62, %v109_v54  ;;  %vm116_vm2 = vweird.f32 %v264_v62 }
  0x40   :  { %v155_v6 = vmul.f32 %v266_v63, %v153_v55  ;;  %vm160_vm4 = vweird.f32 %v266_v63  ;;  %vm117_vm5 = vmor %vm115_vm1, %vm116_vm2 }
  0x41   :  { %v112_v7 = vsub.f32 1.0, %v111_v2  ;;  %vm161_vm7 = vmor %vm159_vm3, %vm160_vm4 }
  0x42   :  { %v156_v10 = vsub.f32 1.0, %v155_v6 }
  0x43   :  { %v113_v12 = vmul.f32 %v264_v62, %v112_v7 }
  0x44   :  { %v157_v14 = vmul.f32 %v266_v63, %v156_v10 }
  0x45   :  { %v114_v16 = vadd.f32 %v264_v62, %v113_v12 }
  0x46   :  { %v158_v23 = vadd.f32 %v266_v63, %v157_v14 }
  0x47   :  { %v118_v24 = vsel %vm117_vm5, %v264_v62, %v114_v16 }
  0x48   :  { %v123_v25 = vsel %vm120_vm6, %v122_v13, %v118_v24  ;;  %v162_v26 = vsel %vm161_vm7, %v266_v63, %v158_v23 }
  0x49   :  { %v124_v27 = vmul.f32 %v123_v25, %v99_v15  ;;  %v167_v28 = vsel %vm164_vm8, %v166_v21, %v162_v26 }
  0x4a   :  { %v168_v29 = vmul.f32 %v167_v28, %v143_v22 }
  0x4b   :  { %v255_v31 = vclamps-f32 %v124_v27, 1.0 }
  0x4c   :  { %v256_v19 = vclamps-f32 %v168_v29, 1.0 }
  0x4d   :  { %v127_v33 = vadd.f32 1.0, %v255_v31 }
  0x4e   :  { %v171_v34 = vadd.f32 1.0, %v256_v19 }
  0x4f   :  { %v128_v35 = vmul.f32 %v127_v33, %v85_v30 }
  0x50   :  { %v172_v36 = vmul.f32 %v171_v34, %v129_v32 }
  0x51   :  { %v173_v20 = vsub.f32 %v446_v0, %v128_v35  ;;  %217 = vst.msk [vmem:[#allocation9] sm:$0x1] %vm216_vm9, %v128_v35 }
  0x52   :  { %v174_v37 = vsub.f32 %v446_v0, %v172_v36  ;;  %218 = vst.msk [vmem:[#allocation9 + $0x1] sm:$0x1] %vm216_vm9, %v172_v36 }
  0x53   :  { %v175_v38 = vmul.f32 %v173_v20, %v173_v20 }
  0x54   :  { %v184_v39 = vmul.f32 %v174_v37, %v174_v37 }
  0x55   :  { %v176_v40 = vsel %vm69_vm0, %v175_v38, 0.0 }
  0x56   :  { %v177_v41 = vrot.slane %v176_v40, 4  ;;  %v185_v42 = vsel %vm69_vm0, %v184_v39, 0.0 }
  0x57   :  { %v186_v17 = vrot.slane %v185_v42, 4 }
  0x58   :  { %v178_v43 = vadd.f32 %v177_v41, %v176_v40 }
  0x59   :  { %v187_v44 = vadd.f32 %v186_v17, %v185_v42 }
  0x5a   :  { %v179_v18 = vrot.slane %v178_v43, 2 }
  0x5b   :  { %v188_v45 = vrot.slane %v187_v44, 2 }
  0x5c   :  { %v180_v46 = vadd.f32 %v179_v18, %v178_v43 }
  0x5d   :  { %v189_v47 = vadd.f32 %v188_v45, %v187_v44 }
  0x5e   :  { %v181_v48 = vrot.slane %v180_v46, 1 }
  0x5f   :  { %v190_v49 = vrot.slane %v189_v47, 1 }
  0x60   :  { %v182_v50 = vadd.f32 %v181_v48, %v180_v46 }
  0x61   :  { %v191_v0 = vadd.f32 %v190_v49, %v189_v47 }
  0x62   :  { %v183_v51 = vmul.f32 0.14285715, %v182_v50 }
  0x63   :  { %v192_v52 = vmul.f32 0.14285715, %v191_v0 }
  0x64   :  { %v194_v53 = vadd.f32 1e-08, %v183_v51  ;;  %219 = vst.msk [vmem:[#allocation9 + $0x2] sm:$0x1] %vm216_vm9, %v183_v51 }
  0x65   :  { %220 = vst.msk [vmem:[#allocation9 + $0x3] sm:$0x1] %vm216_vm9, %v192_v52 }
  0x66   :  { %267 = vrsqrt.f32 %v194_v53  ;;  %242 = dma.vmem_to_hbm [thread:$0]  %s238_s2, 64, %s240_s13, [#allocation10]   ;;  %vm201_vm10 = vweird.f32 %v194_v53 }
  0x6c   :  { %v268_v54 = vpop.eup %267 }
  0x6d   :  { %v196_v55 = vmul.f32 %v268_v54, %v194_v53  ;;  %vm202_vm11 = vweird.f32 %v268_v54 }
  0x6e   :  { %vm203_vm12 = vmor %vm201_vm10, %vm202_vm11 }
  0x6f   :  { %v197_v56 = vmul.f32 %v268_v54, %v196_v55 }
  0x71   :  { %v198_v57 = vmul.f32 0.5, %v197_v56 }
  0x73   :  { %v199_v58 = vsub.f32 1.5, %v198_v57 }
  0x75   :  { %v200_v60 = vmul.f32 %v268_v54, %v199_v58 }
  0x77   :  { %v204_v61 = vsel %vm203_vm12, %v268_v54, %v200_v60 }
  0x78   :  { %v205_v62 = vmul.f32 %v204_v61, %v193_v59 }
  0x7a   :  { %v207_v63 = vperm.slane %v205_v62, 0 }
  0x7c   :  { %v209_v2 = vmul.f32 %v207_v63, %v173_v20 }
  0x7e   :  { %v214_v3 = vadd.f32 %v262_v1, %v209_v2 }
  0x80   :  { %215 = vst.msk [vmem:[#allocation8] sm:$0xff] %vm69_vm0, %v214_v3 }
  0x81   :  { %231 = dma.vmem_to_hbm [thread:$0]  %s227_s18, 128, %s229_s21, [#allocation4]  }
  0x82   :  { %393 = dma.done.wait [#allocation4], 128  }
  0x83   :  { %394 = vsyncadd [#allocation4], 4294967168 }
  0x84   :  { %395 = dma.done.wait [#allocation10], 64  }
  0x85   :  { %396 = vsyncadd [#allocation10], 4294967232 }
  0x86   :  { %251 = vsyncpa [#allocation3], 1 }
  0x87   :  { %252 = vsyncpa [#allocation6], 1 }
  0x88   :  { %253 = vsyncpa [#allocation4], 1 }
  0x89   :  { %254 = vsyncpa [#allocation10], 1 }

</bundles_post_ra>
